<compile_context>
chip_gen: v5e
topology: v5e:2x2
jax: 0.10.0
libtpu: 0.0.40
codegen_flags: <defaults>
</compile_context>

<pallas_src>
import functools
import math

import jax
import jax.numpy as jnp
from jax import lax
from jax.experimental import pallas as pl
from jax.experimental.pallas import tpu as pltpu

HIDDEN = 64     # per-head hidden width (matches nn.Linear(obs_cnt, 64))
FUSED = 128     # actor(64) | critic(64) fused hidden lanes; also fused output lane width


def _cdiv(a, b):
    return -(-a // b)


def _round_up(x, m):
    return ((x + m - 1) // m) * m


def _choose_tile(B, *, block_b=1024, min_split=256, max_tb=8192):
    """Pick (TB, B_pad) minimizing tail padding; force >=2 grid steps for v7x megacore
    once the batch is worth splitting."""
    B8 = _round_up(max(B, 1), 8)
    n_steps = _cdiv(B8, min(block_b, max_tb))
    if B8 >= min_split:
        n_steps = max(n_steps, 2)          # shard the 'parallel' axis across 2 TCs on v7x
    TB = min(_round_up(_cdiv(B8, n_steps), 8), max_tb)
    n_steps = _cdiv(B8, TB)
    return TB, TB * n_steps


# ----------------------------------- kernel -----------------------------------

def actor_critic_kernel(obs_ref, w1_ref, w2_ref, bias_ref, slab_ref, *, action_cnt):
    obs = obs_ref[...]                              # (TB, obs_cnt) f32
    bias = bias_ref[...]                            # (2, FUSED)
    b1 = bias[0:1, :]                               # fused layer-1 bias [b1a | b1c]
    b2 = bias[1:2, :]                               # fused layer-2 bias [b2a | b2c | 0]

    # ---- fused layer 1: one 128-lane matmul -> [actor_hidden | critic_hidden] ----
    # TODO(synk): for real Pong obs (80*80=6400) store W1/obs in bf16 for the MXU inputs.
    h = jnp.dot(obs, w1_ref[...], preferred_element_type=jnp.float32) + b1
    h = jnp.maximum(h, 0.0)                         # shared ReLU activation

    # ---- fused layer 2 (block-diagonal W2): [logits(0:A) | value(A) | zero-pad] ----
    out2 = jnp.dot(h, w2_ref[...], preferred_element_type=jnp.float32) + b2

    # log-sum-exp over the first action_cnt lanes only (Categorical(logits=...));
    # padded lanes and the value lane are masked to -inf so exp(-inf)=0 drops them.
    lane = lax.broadcasted_iota(jnp.int32, out2.shape, 1)
    act_mask = lane < action_cnt
    masked = jnp.where(act_mask, out2, -jnp.inf)
    m = jnp.max(masked, axis=-1, keepdims=True)
    lse = m + jnp.log(jnp.sum(jnp.exp(masked - m), axis=-1, keepdims=True))

    # Single lane-dense slab: [logits | value | lse | 0...]  (unmasked vst, one output)
    keep = lane <= action_cnt                                   # logits + value lanes
    slab_ref[...] = jnp.where(keep, out2,
                              jnp.where(lane == action_cnt + 1, lse, 0.0))

    # TODO(synk): sample_action (Gumbel-max via pltpu.prng_seed/prng_random_bits) and
    # entropy could be fused here so logits never hit HBM; kept outside to match forward().


# ----------------------------------- wrapper -----------------------------------

def actor_critic_slab(obs, packed, action_cnt, *, block_b=1024):
    """obs: (B, obs_cnt) f32. Returns the packed (B_pad, 128) slab
    [logits | value | lse | pad]; rows >= B are padding."""
    B, obs_cnt = obs.shape
    TB, B_pad = _choose_tile(B, block_b=block_b)
    if B_pad != B:
        obs = jnp.pad(obs, ((0, B_pad - B), (0, 0)))
    grid = (B_pad // TB,)

    w1, w2, bias = packed["w1"], packed["w2"], packed["bias"]

    flops = 2 * B_pad * (obs_cnt * FUSED + FUSED * FUSED) + 6 * B_pad * FUSED
    bytes_accessed = 4 * (B_pad * obs_cnt + w1.size + w2.size + bias.size
                          + B_pad * FUSED)
    cost = pl.CostEstimate(flops=flops,
                           transcendentals=B_pad * FUSED,
                           bytes_accessed=bytes_accessed)

    slab = pl.pallas_call(
        functools.partial(actor_critic_kernel, action_cnt=action_cnt),
        out_shape=jax.ShapeDtypeStruct((B_pad, FUSED), jnp.float32),
        grid=grid,
        in_specs=[
            pl.BlockSpec((TB, obs_cnt), lambda i: (i, 0)),       # obs tile
            pl.BlockSpec((obs_cnt, FUSED), lambda i: (0, 0)),    # fused W1 (resident)
            pl.BlockSpec((FUSED, FUSED), lambda i: (0, 0)),      # fused W2 (resident)
            pl.BlockSpec((2, FUSED), lambda i: (0, 0)),          # fused biases
        ],
        out_specs=pl.BlockSpec((TB, FUSED), lambda i: (i, 0)),   # [logits|value|lse|pad]
        compiler_params=pltpu.CompilerParams(
            dimension_semantics=("parallel",)),                  # both TCs on v7x
        cost_estimate=cost,
    )(obs, w1, w2, bias)
    return slab


def unpack_slab(slab, B, action_cnt):
    """Consumer-side derivation (fuses into downstream ops): logits, log_probs, value."""
    logits = slab[:B, :action_cnt]
    value = slab[:B, action_cnt:action_cnt + 1]
    lse = slab[:B, action_cnt + 1:action_cnt + 2]
    log_probs = logits - lse
    return logits, log_probs, value


def actor_critic_forward(obs, packed, action_cnt, *, block_b=1024):
    """Convenience: run the kernel and unpack (logits, log_probs, value)."""
    slab = actor_critic_slab(obs, packed, action_cnt, block_b=block_b)
    return unpack_slab(slab, obs.shape[0], action_cnt)


# ----------------------------- parameter handling -----------------------------

def xavier_uniform(key, fan_in, fan_out):
    # matches torch.nn.init.xavier_uniform_ (gain=1.0); stored as (in, out)
    bound = math.sqrt(6.0 / (fan_in + fan_out))
    return jax.random.uniform(key, (fan_in, fan_out), jnp.float32, -bound, bound)


def linear_bias(key, fan_in, fan_out):
    # matches PyTorch nn.Linear default bias init: U(-1/sqrt(fan_in), 1/sqrt(fan_in))
    bound = 1.0 / math.sqrt(fan_in)
    return jax.random.uniform(key, (1, fan_out), jnp.float32, -bound, bound)


def init_params(key, obs_cnt, action_cnt, hidden=HIDDEN):
    ks = jax.random.split(key, 8)
    return {
        "w1a": xavier_uniform(ks[0], obs_cnt, hidden),
        "b1a": linear_bias(ks[1], obs_cnt, hidden),
        "w2a": xavier_uniform(ks[2], hidden, action_cnt),
        "b2a": linear_bias(ks[3], hidden, action_cnt),
        "w1c": xavier_uniform(ks[4], obs_cnt, hidden),
        "b1c": linear_bias(ks[5], obs_cnt, hidden),
        "w2c": xavier_uniform(ks[6], hidden, 1),
        "b2c": linear_bias(ks[7], hidden, 1),
    }


def pack_params(p, action_cnt, hidden=HIDDEN, fused=FUSED):
    """Fuse actor+critic params into 3 arrays for the kernel."""
    w1 = jnp.concatenate([p["w1a"], p["w1c"]], axis=1)                 # (obs, 128)
    b1 = jnp.concatenate([p["b1a"], p["b1c"]], axis=1)                 # (1, 128)
    w2 = jnp.zeros((fused, fused), jnp.float32)
    w2 = w2.at[:hidden, :action_cnt].set(p["w2a"])                     # actor block
    w2 = w2.at[hidden:, action_cnt:action_cnt + 1].set(p["w2c"])       # critic block
    b2 = jnp.zeros((1, fused), jnp.float32)
    b2 = b2.at[:, :action_cnt].set(p["b2a"])
    b2 = b2.at[:, action_cnt:action_cnt + 1].set(p["b2c"])
    bias = jnp.concatenate([b1, b2], axis=0)                           # (2, 128)
    return {"w1": w1, "w2": w2, "bias": bias}


def reference_forward(obs, p):
    ha = jnp.maximum(obs @ p["w1a"] + p["b1a"], 0.0)
    logits = ha @ p["w2a"] + p["b2a"]
    hc = jnp.maximum(obs @ p["w1c"] + p["b1c"], 0.0)
    value = hc @ p["w2c"] + p["b2c"]
    logp = logits - jax.scipy.special.logsumexp(logits, axis=-1, keepdims=True)
    return logits, logp, value


if __name__ == "__main__":
    OBS_CNT, ACTION_CNT = 16, 6   # small Pong-like setup (6 actions)

    key = jax.random.PRNGKey(0)
    k_obs, k_params, k_obs2 = jax.random.split(key, 3)
    params = init_params(k_params, OBS_CNT, ACTION_CNT)
    packed = pack_params(params, ACTION_CNT)

    # --- small (single grid point) case, matches the original module usage ---
    obs = jax.random.normal(k_obs, (2, OBS_CNT), dtype=jnp.float32)
    logits, log_probs, value = actor_critic_forward(obs, packed, ACTION_CNT)
    jax.block_until_ready((logits, log_probs, value))

    ref_logits, ref_logp, ref_value = reference_forward(obs, params)
    assert jnp.allclose(logits, ref_logits, atol=1e-5)
    assert jnp.allclose(value, ref_value, atol=1e-5)
    assert jnp.allclose(log_probs, ref_logp, atol=1e-5)

    # --- batched case exercising the 2-step parallel grid + minimal tail padding ---
    obs_b = jax.random.normal(k_obs2, (264, OBS_CNT), dtype=jnp.float32)
    logits_b, logp_b, value_b = actor_critic_forward(obs_b, packed, ACTION_CNT)
    jax.block_until_ready((logits_b, logp_b, value_b))

    ref_logits_b, ref_logp_b, ref_value_b = reference_forward(obs_b, params)
    assert jnp.allclose(logits_b, ref_logits_b, atol=1e-5)
    assert jnp.allclose(value_b, ref_value_b, atol=1e-5)
    assert jnp.allclose(logp_b, ref_logp_b, atol=1e-5)

    print("KERNEL_OK")
</pallas_src>

<mosaic_0001>
module attributes {stable_mosaic.version = 11 : i64} {
  func.func @actor_critic_kernel(%arg0: i32, %arg1: memref<8x16xf32, #tpu.memory_space<vmem>>, %arg2: memref<16x128xf32, #tpu.memory_space<vmem>>, %arg3: memref<128x128xf32, #tpu.memory_space<vmem>>, %arg4: memref<2x128xf32, #tpu.memory_space<vmem>>, %arg5: memref<8x128xf32, #tpu.memory_space<vmem>>) attributes {dimension_semantics = [#tpu.dimension_semantics<parallel>], iteration_bounds = array<i64: 1>, scalar_prefetch = 0 : i64, scratch_operands = 0 : i64, tpu.core_type = #tpu.core_type<tc>, window_params = [{transform_indices = @transform_0, window_bounds = array<i64: 8, 16>}, {pipeline_mode = #tpu.pipeline_mode<synchronous>, transform_indices = @transform_1, window_bounds = array<i64: 16, 128>}, {pipeline_mode = #tpu.pipeline_mode<synchronous>, transform_indices = @transform_2, window_bounds = array<i64: 128, 128>}, {pipeline_mode = #tpu.pipeline_mode<synchronous>, transform_indices = @transform_3, window_bounds = array<i64: 2, 128>}, {transform_indices = @transform_4, window_bounds = array<i64: 8, 128>}]} {
    %c0 = arith.constant 0 : index
    %c0_0 = arith.constant 0 : index
    %0 = vector.load %arg1[%c0, %c0_0] : memref<8x16xf32, #tpu.memory_space<vmem>>, vector<8x16xf32>
    %c0_1 = arith.constant 0 : index
    %c0_2 = arith.constant 0 : index
    %1 = vector.load %arg4[%c0_1, %c0_2] : memref<2x128xf32, #tpu.memory_space<vmem>>, vector<2x128xf32>
    %2 = vector.extract_strided_slice %1 {offsets = [0, 0], sizes = [1, 128], strides = [1, 1]} : vector<2x128xf32> to vector<1x128xf32>
    %3 = vector.extract_strided_slice %1 {offsets = [1, 0], sizes = [1, 128], strides = [1, 1]} : vector<2x128xf32> to vector<1x128xf32>
    %c0_3 = arith.constant 0 : index
    %c0_4 = arith.constant 0 : index
    %4 = vector.load %arg2[%c0_3, %c0_4] : memref<16x128xf32, #tpu.memory_space<vmem>>, vector<16x128xf32>
    %cst = arith.constant dense<0.000000e+00> : vector<8x128xf32>
    %5 = tpu.matmul %0, %4, %cst {dimension_numbers = #tpu.dot_dimension_numbers<[1], [0], [0], [1], [0, 0, 1, 1], [], []>} : vector<8x16xf32>, vector<16x128xf32>, vector<8x128xf32> -> vector<8x128xf32>
    %6 = vector.broadcast %2 : vector<1x128xf32> to vector<8x128xf32>
    %7 = arith.addf %5, %6 : vector<8x128xf32>
    %cst_5 = arith.constant 0.000000e+00 : f32
    %8 = vector.broadcast %cst_5 : f32 to vector<8x128xf32>
    %9 = arith.maximumf %7, %8 : vector<8x128xf32>
    %c0_6 = arith.constant 0 : index
    %c0_7 = arith.constant 0 : index
    %10 = vector.load %arg3[%c0_6, %c0_7] : memref<128x128xf32, #tpu.memory_space<vmem>>, vector<128x128xf32>
    %cst_8 = arith.constant dense<0.000000e+00> : vector<8x128xf32>
    %11 = tpu.matmul %9, %10, %cst_8 {dimension_numbers = #tpu.dot_dimension_numbers<[1], [0], [0], [1], [0, 0, 1, 1], [], []>} : vector<8x128xf32>, vector<128x128xf32>, vector<8x128xf32> -> vector<8x128xf32>
    %12 = vector.broadcast %3 : vector<1x128xf32> to vector<8x128xf32>
    %13 = arith.addf %11, %12 : vector<8x128xf32>
    %14 = tpu.iota {dimensions = array<i32: 1>} : vector<8x128xi32>
    %c6_i32 = arith.constant 6 : i32
    %15 = vector.broadcast %c6_i32 : i32 to vector<8x128xi32>
    %16 = arith.cmpi slt, %14, %15 : vector<8x128xi32>
    %cst_9 = arith.constant 0xFF800000 : f32
    %17 = vector.broadcast %cst_9 : f32 to vector<8x128xf32>
    %18 = arith.select %16, %13, %17 : vector<8x128xi1>, vector<8x128xf32>
    %cst_10 = arith.constant dense<0xFF800000> : vector<8xf32>
    %19 = vector.multi_reduction <maximumf>, %18, %cst_10 [1] : vector<8x128xf32> to vector<8xf32>
    %20 = vector.shape_cast %19 : vector<8xf32> to vector<8x1xf32>
    %21 = vector.broadcast %20 : vector<8x1xf32> to vector<8x128xf32>
    %22 = arith.subf %18, %21 : vector<8x128xf32>
    %23 = math.exp %22 : vector<8x128xf32>
    %cst_11 = arith.constant dense<0.000000e+00> : vector<8xf32>
    %24 = vector.multi_reduction <add>, %23, %cst_11 [1] : vector<8x128xf32> to vector<8xf32>
    %25 = vector.shape_cast %24 : vector<8xf32> to vector<8x1xf32>
    %26 = math.log %25 : vector<8x1xf32>
    %27 = arith.addf %20, %26 : vector<8x1xf32>
    %c6_i32_12 = arith.constant 6 : i32
    %28 = vector.broadcast %c6_i32_12 : i32 to vector<8x128xi32>
    %29 = arith.cmpi sle, %14, %28 : vector<8x128xi32>
    %c7_i32 = arith.constant 7 : i32
    %30 = vector.broadcast %c7_i32 : i32 to vector<8x128xi32>
    %31 = arith.cmpi eq, %14, %30 : vector<8x128xi32>
    %cst_13 = arith.constant 0.000000e+00 : f32
    %32 = vector.shape_cast %27 : vector<8x1xf32> to vector<8x1xf32>
    %33 = vector.broadcast %32 : vector<8x1xf32> to vector<8x128xf32>
    %34 = vector.broadcast %cst_13 : f32 to vector<8x128xf32>
    %35 = arith.select %31, %33, %34 : vector<8x128xi1>, vector<8x128xf32>
    %36 = arith.select %29, %13, %35 : vector<8x128xi1>, vector<8x128xf32>
    %c0_14 = arith.constant 0 : index
    %c0_15 = arith.constant 0 : index
    %37 = vector.load %arg5[%c0_14, %c0_15] : memref<8x128xf32, #tpu.memory_space<vmem>>, vector<8x128xf32>
    tpu.vector_store %arg5[%c0_14, %c0_15], %36 {strides = array<i32>} : memref<8x128xf32, #tpu.memory_space<vmem>>, vector<8x128xf32>,
    return
  }
  func.func @transform_0(%arg0: i32) -> (i32, i32) {
    %c0_i32 = arith.constant 0 : i32
    %c0_i32_0 = arith.constant 0 : i32
    return %arg0, %c0_i32 : i32, i32
  }
  func.func @transform_1(%arg0: i32) -> (i32, i32) {
    %c0_i32 = arith.constant 0 : i32
    %c0_i32_0 = arith.constant 0 : i32
    %c0_i32_1 = arith.constant 0 : i32
    return %c0_i32, %c0_i32_0 : i32, i32
  }
  func.func @transform_2(%arg0: i32) -> (i32, i32) {
    %c0_i32 = arith.constant 0 : i32
    %c0_i32_0 = arith.constant 0 : i32
    %c0_i32_1 = arith.constant 0 : i32
    return %c0_i32, %c0_i32_0 : i32, i32
  }
  func.func @transform_3(%arg0: i32) -> (i32, i32) {
    %c0_i32 = arith.constant 0 : i32
    %c0_i32_0 = arith.constant 0 : i32
    %c0_i32_1 = arith.constant 0 : i32
    return %c0_i32, %c0_i32_0 : i32, i32
  }
  func.func @transform_4(%arg0: i32) -> (i32, i32) {
    %c0_i32 = arith.constant 0 : i32
    %c0_i32_0 = arith.constant 0 : i32
    return %arg0, %c0_i32 : i32, i32
  }
}

</mosaic_0001>

<bundles_post_ra>
// kernel: tpu_custom_call.1
= control target key start
LH: loop header
LB: loop body
LE: loop exit
PB: predicated region body
PF: predicated region fallthrough
CT: control target
= control target key end

     0   :  { %9 = vsyncpa [#allocation3], 0  ;;  %s326_s0 = inlined_call_operand.hbm [shape: f32[8,16], index: 0, kind: input, shape index: {}]   ;;  %s327_s1 = inlined_call_operand.hbm [shape: f32[16,128], index: 1, kind: input, shape index: {}]   ;;  %s328_s2 = inlined_call_operand.hbm [shape: f32[128,128], index: 2, kind: input, shape index: {}]   ;;  %s329_s3 = inlined_call_operand.vmem [shape: f32[2,128], index: 3, kind: input, shape index: {}]   ;;  %s330_s4 = inlined_call_operand.hbm [shape: f32[8,128], index: 4, kind: output, shape index: {}]  }
   0x1   :  { %10 = vsyncpa [#allocation6], 0  ;;  %s27_s17 = sshll.u32 %s327_s1, 4  ;;  %s28_s17 = int_to_ptr.hbm [resolvable:$true] %s27_s17 }
   0x2   :  { %11 = vsyncpa [#allocation4], 0  ;;  %s280_s18 = smov [#allocation5]   ;;  %s17_s22 = sshll.u32 %s326_s0, 4  ;;  %s18_s22 = int_to_ptr.hbm [resolvable:$true] %s17_s22 }
   0x3   :  { %s29_s19 = sshll.u32 %s280_s18, 4  ;;  %s281_s23 = smov 128   ;;  %s30_s19 = int_to_ptr.vmem [resolvable:$true] %s29_s19 }
   0x4   :  { %s282_s24 = smov 8   ;;  %s283_s25 = smov [#allocation2]  }
   0x5   :  { %35 = dma.hbm_to_vmem [thread:$0]  %s28_s17, 256, %s30_s19, [#allocation6], %s281_s23, %s281_s23, %s282_s24  }
   0x6   :  { %s19_s26 = sshll.u32 %s283_s25, 4  ;;  %s40_s29 = sshll.u32 %s328_s2, 4  ;;  %s20_s26 = int_to_ptr.vmem [resolvable:$true] %s19_s26  ;;  %s41_s29 = int_to_ptr.hbm [resolvable:$true] %s40_s29 }
   0x7   :  { %22 = dma.hbm_to_vmem [thread:$0]  %s18_s22, 128, %s20_s26, [#allocation3]  }
   0x8   :  { %s284_s1 = smov [#allocation7]  }
   0x9   :  { %s42_s30 = sshll.u32 %s284_s1, 4  ;;  %s43_s30 = int_to_ptr.vmem [resolvable:$true] %s42_s30 }
   0xa   :  { %48 = dma.hbm_to_vmem [thread:$0]  %s41_s29, 2048, %s43_s30, [#allocation6], %s281_s23, %s281_s23, %s282_s24  }
   0xb   :  { %274 = dma.done.wait [#allocation3], 128  }
   0xc   :  { %275 = vsyncadd [#allocation3], 4294967168 }
   0xd   :  { %276 = dma.done.wait [#allocation6], 2304  }
   0xe   :  { %277 = vsyncadd [#allocation6], 4294964992  ;;  %v66_v0 = vld [vmem:[#allocation5 + $0x8] sm:$0xff]  ;;  %v65_v1 = vld [vmem:[#allocation5] sm:$0xff]  ;;  %vm68_vm0 = vcmask 130048   ;;  %v130_v24 = vlaneseq  ;;  %s156_s8 = sshll.u32 %s330_s4, 4  ;;  %s157_s8 = int_to_ptr.hbm [resolvable:$true] %s156_s8 }
   0xf   :  { %86 = vmatpush.msra.mxu0 %v66_v0  ;;  %v63_v2 = vld [vmem:[#allocation2] sm:$0xff]  ;;  %v108_v3 = vld [vmem:[#allocation7 + $0x78] sm:$0xff]  ;;  %v107_v4 = vld [vmem:[#allocation7 + $0x70] sm:$0xff] }
  0x10   :  { %110 = vmatpush.msra.mxu1 %v108_v3  ;;  %v106_v5 = vld [vmem:[#allocation7 + $0x68] sm:$0xff]  ;;  %v105_v6 = vld [vmem:[#allocation7 + $0x60] sm:$0xff]  ;;  %v104_v7 = vld [vmem:[#allocation7 + $0x58] sm:$0xff]  ;;  %v131_v25 = vand.u32 127, %v130_v24 }
  0x11   :  { %87 = vmatpush.msra.mxu0 %v65_v1  ;;  %v103_v8 = vld [vmem:[#allocation7 + $0x50] sm:$0xff]  ;;  %v102_v9 = vld [vmem:[#allocation7 + $0x48] sm:$0xff]  ;;  %v101_v10 = vld [vmem:[#allocation7 + $0x40] sm:$0xff] }
  0x12   :  { %167 = vmatmul.msk.f32.vlgmr.msra.gmra.mxu0 %vm68_vm0, %v63_v2  ;;  %111 = vmatpush.msra.mxu1 %v107_v4  ;;  %v100_v11 = vld [vmem:[#allocation7 + $0x38] sm:$0xff]  ;;  %v99_v12 = vld [vmem:[#allocation7 + $0x30] sm:$0xff]  ;;  %v98_v13 = vld [vmem:[#allocation7 + $0x28] sm:$0xff]  ;;  %vm132_vm1 = vcmp.lt.s32.totalorder %v131_v25, 6  ;;  %vm145_vm2 = vcmp.eq.s32.totalorder %v131_v25, 7  ;;  %vm144_vm3 = vcmp.le.s32.totalorder %v131_v25, 6 }
  0x13   :  { %v97_v14 = vld [vmem:[#allocation7 + $0x20] sm:$0xff]  ;;  %v96_v15 = vld [vmem:[#allocation7 + $0x18] sm:$0xff]  ;;  %v95_v16 = vld [vmem:[#allocation7 + $0x10] sm:$0xff] }
  0x14   :  { %112 = vmatpush.msra.mxu1 %v106_v5  ;;  %v94_v17 = vld [vmem:[#allocation7 + $0x8] sm:$0xff]  ;;  %v93_v18 = vld [vmem:[#allocation7] sm:$0xff] }
  0x15   :  { %v64_v19 = vld [vmem:[%s329_s3] sm:$0x3]  ;;  %s285_s3 = smov [#allocation8]  }
  0x16   :  { %113 = vmatpush.msra.mxu1 %v105_v6  ;;  %v67_v20 = vperm.slane %v64_v19, 0  ;;  %v109_v26 = vperm.slane %v64_v19, 1  ;;  %s154_s5 = sshll.u32 %s285_s3, 4  ;;  %s155_s5 = int_to_ptr.vmem [resolvable:$true] %s154_s5 }
  0x18   :  { %114 = vmatpush.msra.mxu1 %v104_v7 }
  0x1a   :  { %115 = vmatpush.msra.mxu1 %v103_v8 }
  0x1c   :  { %116 = vmatpush.msra.mxu1 %v102_v9 }
  0x1e   :  { %117 = vmatpush.msra.mxu1 %v101_v10 }
  0x20   :  { %118 = vmatpush.msra.mxu1 %v100_v11 }
  0x22   :  { %119 = vmatpush.msra.mxu1 %v99_v12 }
  0x24   :  { %120 = vmatpush.msra.mxu1 %v98_v13 }
  0x26   :  { %121 = vmatpush.msra.mxu1 %v97_v14 }
  0x28   :  { %122 = vmatpush.msra.mxu1 %v96_v15 }
  0x2a   :  { %123 = vmatpush.msra.mxu1 %v95_v16 }
  0x2c   :  { %124 = vmatpush.msra.mxu1 %v94_v17 }
  0x2e   :  { %125 = vmatpush.msra.mxu1 %v93_v18 }
  0x8f   :  { %v89_v21 = vpop.f32.mrf.mxu0 }
  0x90   :  { %v90_v22 = vadd.f32 %v89_v21, %v67_v20 }
  0x92   :  { %v92_v23 = vmax.f32 %v90_v22, 0.0 }
  0x94   :  { %126 = vmatmul.f32.vlgmr.msra.gmra.mxu1 %v92_v23 }
 0x111   :  { %v127_v27 = vpop.f32.mrf.mxu1 }
 0x112   :  { %v128_v28 = vadd.f32 %v127_v27, %v109_v26 }
 0x114   :  { %v133_v29 = vsel %vm132_vm1, %v128_v28, -inf }
 0x115   :  { %134 = vmax.xlane.f32.xlu0 %v133_v29 }
 0x188   :  { %v135_v30 = vpop.xlane.xlu0 %134 }
 0x189   :  { %v136_v31 = vsub.f32 %v133_v29, %v135_v30 }
 0x18b   :  { %v137_v32 = vmul.f32 1.442695, %v136_v31 }
 0x18d   :  { %174 = vpow2.f32 %v137_v32 }
 0x193   :  { %v175_v33 = vpop.eup %174 }
 0x194   :  { %139 = vadd.xlane.f32.xlu0 %v175_v33 }
 0x207   :  { %v140_v34 = vpop.xlane.xlu0 %139 }
 0x208   :  { %176 = vlog2.f32 %v140_v34 }
 0x20e   :  { %v177_v35 = vpop.eup %176 }
 0x20f   :  { %v142_v36 = vmul.f32 0.6931472, %v177_v35 }
 0x211   :  { %v143_v37 = vadd.f32 %v142_v36, %v135_v30 }
 0x213   :  { %v146_v38 = vsel %vm145_vm2, %v143_v37, 0.0 }
 0x214   :  { %v147_v39 = vsel %vm144_vm3, %v128_v28, %v146_v38 }
 0x215   :  { %148 = vst [vmem:[#allocation8] sm:$0xff] %v147_v39 }
 0x216   :  { %159 = dma.vmem_to_hbm [thread:$0]  %s155_s5, 128, %s157_s8, [#allocation4]  }
 0x217   :  { %278 = dma.done.wait [#allocation4], 128  }
 0x218   :  { %279 = vsyncadd [#allocation4], 4294967168 }
 0x219   :  { %164 = vsyncpa [#allocation3], 1 }
 0x21a   :  { %165 = vsyncpa [#allocation6], 1 }
 0x21b   :  { %166 = vsyncpa [#allocation4], 1 }

</bundles_post_ra>
